<compile_context>
chip_gen: v6e
topology: v6e:2x2x1
jax: 0.10.0
libtpu: 0.0.40
codegen_flags: <defaults>
</compile_context>

<pallas_src>
import math

import jax
import jax.numpy as jnp
import numpy as np
from jax.experimental import pallas as pl
from jax.experimental.pallas import tpu as pltpu

GN_EPS = 1e-5


def _group_norm(h, gmat, inv_n, gamma, beta):
    """GroupNorm on a (T, C) channel-last tile.

    gmat: (C, C) 0/1 group-membership matrix; inv_n = 1 / (T * channels_per_group).
    """
    s1 = jnp.sum(h, axis=0, keepdims=True)                               # (1, C)
    mu = jnp.dot(s1, gmat, preferred_element_type=jnp.float32) * inv_n   # (1, C)
    d = h - mu
    s2 = jnp.sum(d * d, axis=0, keepdims=True)
    var = jnp.dot(s2, gmat, preferred_element_type=jnp.float32) * inv_n
    return d * jax.lax.rsqrt(var + GN_EPS) * gamma + beta


def _make_res1d_kernel(*, stride, t_out, has_ds, act, inv_n, c_out):
    K = 3

    def _rows(xp_ref, start):
        # Strided tap rows loaded directly from VMEM: start, start+stride, ...
        if stride == 1:
            return xp_ref[pl.ds(start, t_out), :]
        return xp_ref[pl.ds(start, t_out, stride), :]

    def kernel(*refs):
        xp_ref = refs[0]
        w1_ref, g1w_ref, g1b_ref, w2_ref, g2w_ref, g2b_ref, gmat_ref = refs[1:8]
        if has_ds:
            wd_ref, gdw_ref, gdb_ref = refs[8:11]
            out_ref, hpad_ref = refs[11:13]
        else:
            out_ref, hpad_ref = refs[8:10]

        gmat = gmat_ref[...]

        # ---- conv1 (k=3, stride; time axis pre-padded by the wrapper) ----
        h = jnp.zeros((t_out, c_out), jnp.float32)
        for d in range(K):
            h = h + jnp.dot(_rows(xp_ref, d).astype(jnp.float32), w1_ref[d],
                            preferred_element_type=jnp.float32)

        # ---- GroupNorm1 + ReLU ----
        h = jnp.maximum(_group_norm(h, gmat, inv_n, g1w_ref[...], g1b_ref[...]), 0.0)

        # ---- conv2 (k=3, stride=1); zero halo via VMEM scratch ----
        hpad_ref[...] = jnp.zeros_like(hpad_ref)
        hpad_ref[pl.ds(1, t_out), :] = h
        o = jnp.zeros((t_out, c_out), jnp.float32)
        for d in range(K):
            o = o + jnp.dot(hpad_ref[pl.ds(d, t_out), :], w2_ref[d],
                            preferred_element_type=jnp.float32)

        # ---- GroupNorm2 ----
        o = _group_norm(o, gmat, inv_n, g2w_ref[...], g2b_ref[...])

        # ---- residual branch (identity or 1x1-conv + GroupNorm) ----
        res_rows = _rows(xp_ref, 1).astype(jnp.float32)   # original (unpadded) rows
        if has_ds:
            r = jnp.dot(res_rows, wd_ref[...], preferred_element_type=jnp.float32)
            r = _group_norm(r, gmat, inv_n, gdw_ref[...], gdb_ref[...])
        else:
            r = res_rows
        o = o + r
        if act:
            o = jnp.maximum(o, 0.0)
        out_ref[...] = o.astype(out_ref.dtype)

    return kernel


def res1d_pallas(x, params, *, stride, n_groups, act=True):
    """x: (B, C_in, T) float32 (PyTorch layout). Returns (B, C_out, T_out)."""
    B, C_in, T = x.shape
    w1 = params["w1"]                                 # (3, C_in, C_out)
    C_out = w1.shape[-1]
    pad = 1
    T_out = (T + 2 * pad - 3) // stride + 1
    has_ds = (stride != 1) or (C_out != C_in)
    cg = C_out // n_groups
    inv_n = 1.0 / float(cg * T_out)

    # channel-last + halo-padded time axis (padding done once, outside)
    xp = jnp.pad(jnp.transpose(x, (0, 2, 1)), ((0, 0), (pad, pad), (0, 0)))

    gidx = jnp.arange(C_out) // cg
    gmat = (gidx[:, None] == gidx[None, :]).astype(jnp.float32)   # (C_out, C_out)

    weight_args = [w1, params["g1w"], params["g1b"], params["w2"],
                   params["g2w"], params["g2b"], gmat]
    if has_ds:
        weight_args += [params["wd"], params["gdw"], params["gdb"]]

    def _const_spec(a):
        nd = a.ndim
        return pl.BlockSpec(a.shape, lambda b, _n=nd: (0,) * _n)

    in_specs = [pl.BlockSpec((None, T + 2 * pad, C_in), lambda b: (b, 0, 0))]
    in_specs += [_const_spec(a) for a in weight_args]

    kernel = _make_res1d_kernel(stride=stride, t_out=T_out, has_ds=has_ds,
                                act=act, inv_n=inv_n, c_out=C_out)

    out = pl.pallas_call(
        kernel,
        out_shape=jax.ShapeDtypeStruct((B, T_out, C_out), jnp.float32),
        grid_spec=pltpu.PrefetchScalarGridSpec(
            num_scalar_prefetch=0,
            grid=(B,),
            in_specs=in_specs,
            out_specs=pl.BlockSpec((None, T_out, C_out), lambda b: (b, 0, 0)),
            scratch_shapes=[pltpu.VMEM((T_out + 2, C_out), jnp.float32)],
        ),
        compiler_params=pltpu.CompilerParams(dimension_semantics=("parallel",)),
    )(xp, *weight_args)
    return jnp.transpose(out, (0, 2, 1))              # back to (B, C_out, T_out)


# ---------------- pure-JAX reference (mirrors PyTorch Res1d.forward) ----------------
def _ref_groupnorm(x, groups, gamma, beta):
    B, C, T = x.shape
    xg = x.reshape(B, groups, C // groups, T)
    mu = xg.mean(axis=(2, 3), keepdims=True)
    var = ((xg - mu) ** 2).mean(axis=(2, 3), keepdims=True)
    xn = ((xg - mu) / jnp.sqrt(var + GN_EPS)).reshape(B, C, T)
    return xn * gamma[None, :, None] + beta[None, :, None]


def _ref_conv1d(x, w, stride, padding):
    return jax.lax.conv_general_dilated(
        x, w, window_strides=(stride,), padding=[(padding, padding)],
        dimension_numbers=("NCH", "OIH", "NCH"),
        precision=jax.lax.Precision.HIGHEST)


def res1d_ref(x, params, *, stride, n_groups, act=True):
    C_in = x.shape[1]
    C_out = params["w1"].shape[-1]
    w1_t = jnp.transpose(params["w1"], (2, 1, 0))     # (C_out, C_in, 3) torch layout
    w2_t = jnp.transpose(params["w2"], (2, 1, 0))
    out = _ref_conv1d(x, w1_t, stride, 1)
    out = _ref_groupnorm(out, n_groups, params["g1w"][0], params["g1b"][0])
    out = jax.nn.relu(out)
    out = _ref_conv1d(out, w2_t, 1, 1)
    out = _ref_groupnorm(out, n_groups, params["g2w"][0], params["g2b"][0])
    if stride != 1 or C_out != C_in:
        wd_t = params["wd"].T[:, :, None]             # (C_out, C_in, 1)
        r = _ref_conv1d(x, wd_t, stride, 0)
        r = _ref_groupnorm(r, n_groups, params["gdw"][0], params["gdb"][0])
    else:
        r = x
    out = out + r
    if act:
        out = jax.nn.relu(out)
    return out


# ---------------- deterministic synthetic parameters ----------------
def init_params(key, c_in, c_out, has_ds):
    ks = jax.random.split(key, 9)
    p = dict(
        w1=0.1 * jax.random.normal(ks[0], (3, c_in, c_out), jnp.float32),
        g1w=1.0 + 0.1 * jax.random.normal(ks[1], (1, c_out), jnp.float32),
        g1b=0.1 * jax.random.normal(ks[2], (1, c_out), jnp.float32),
        w2=0.1 * jax.random.normal(ks[3], (3, c_out, c_out), jnp.float32),
        g2w=1.0 + 0.1 * jax.random.normal(ks[4], (1, c_out), jnp.float32),
        g2b=0.1 * jax.random.normal(ks[5], (1, c_out), jnp.float32),
    )
    if has_ds:
        p.update(
            wd=0.1 * jax.random.normal(ks[6], (c_in, c_out), jnp.float32),
            gdw=1.0 + 0.1 * jax.random.normal(ks[7], (1, c_out), jnp.float32),
            gdb=0.1 * jax.random.normal(ks[8], (1, c_out), jnp.float32),
        )
    return p


if __name__ == "__main__":
    key = jax.random.PRNGKey(0)
    NG = 32   # 'ng' default of Res1d

    # Config 1: stride=2, C_in != C_out  -> downsample path (1x1 conv + GN)
    B, C_in, C_out, T, stride = 2, 16, 24, 16, 2
    groups = math.gcd(NG, C_out)                      # gcd(ng, n_out), as in Res1d
    k_x, k_p = jax.random.split(jax.random.fold_in(key, 1))
    x = jax.random.normal(k_x, (B, C_in, T), jnp.float32)
    params = init_params(k_p, C_in, C_out, has_ds=True)
    out = jax.block_until_ready(
        res1d_pallas(x, params, stride=stride, n_groups=groups))
    ref = res1d_ref(x, params, stride=stride, n_groups=groups)
    np.testing.assert_allclose(np.asarray(out), np.asarray(ref),
                               rtol=1e-3, atol=1e-3)

    # Config 2: stride=1, C_in == C_out  -> identity residual path
    B2, C2, T2 = 2, 32, 16
    groups2 = math.gcd(NG, C2)
    k_x2, k_p2 = jax.random.split(jax.random.fold_in(key, 2))
    x2 = jax.random.normal(k_x2, (B2, C2, T2), jnp.float32)
    params2 = init_params(k_p2, C2, C2, has_ds=False)
    out2 = jax.block_until_ready(
        res1d_pallas(x2, params2, stride=1, n_groups=groups2))
    ref2 = res1d_ref(x2, params2, stride=1, n_groups=groups2)
    np.testing.assert_allclose(np.asarray(out2), np.asarray(ref2),
                               rtol=1e-3, atol=1e-3)

    print("KERNEL_OK")
</pallas_src>

<mosaic_0001>
module attributes {stable_mosaic.version = 11 : i64} {
  func.func @kernel(%arg0: i32, %arg1: memref<1x18x16xf32, #tpu.memory_space<vmem>>, %arg2: memref<3x16x24xf32, #tpu.memory_space<vmem>>, %arg3: memref<1x24xf32, #tpu.memory_space<vmem>>, %arg4: memref<1x24xf32, #tpu.memory_space<vmem>>, %arg5: memref<3x24x24xf32, #tpu.memory_space<vmem>>, %arg6: memref<1x24xf32, #tpu.memory_space<vmem>>, %arg7: memref<1x24xf32, #tpu.memory_space<vmem>>, %arg8: memref<24x24xf32, #tpu.memory_space<vmem>>, %arg9: memref<16x24xf32, #tpu.memory_space<vmem>>, %arg10: memref<1x24xf32, #tpu.memory_space<vmem>>, %arg11: memref<1x24xf32, #tpu.memory_space<vmem>>, %arg12: memref<1x8x24xf32, #tpu.memory_space<vmem>>, %arg13: memref<10x24xf32, #tpu.memory_space<vmem>>) attributes {dimension_semantics = [#tpu.dimension_semantics<parallel>], iteration_bounds = array<i64: 2>, scalar_prefetch = 0 : i64, scratch_operands = 1 : i64, tpu.core_type = #tpu.core_type<tc>, window_params = [{transform_indices = @transform_0, window_bounds = array<i64: 1, 18, 16>}, {pipeline_mode = #tpu.pipeline_mode<synchronous>, transform_indices = @transform_1, window_bounds = array<i64: 3, 16, 24>}, {pipeline_mode = #tpu.pipeline_mode<synchronous>, transform_indices = @transform_2, window_bounds = array<i64: 1, 24>}, {pipeline_mode = #tpu.pipeline_mode<synchronous>, transform_indices = @transform_3, window_bounds = array<i64: 1, 24>}, {pipeline_mode = #tpu.pipeline_mode<synchronous>, transform_indices = @transform_4, window_bounds = array<i64: 3, 24, 24>}, {pipeline_mode = #tpu.pipeline_mode<synchronous>, transform_indices = @transform_5, window_bounds = array<i64: 1, 24>}, {pipeline_mode = #tpu.pipeline_mode<synchronous>, transform_indices = @transform_6, window_bounds = array<i64: 1, 24>}, {pipeline_mode = #tpu.pipeline_mode<synchronous>, transform_indices = @transform_7, window_bounds = array<i64: 24, 24>}, {pipeline_mode = #tpu.pipeline_mode<synchronous>, transform_indices = @transform_8, window_bounds = array<i64: 16, 24>}, {pipeline_mode = #tpu.pipeline_mode<synchronous>, transform_indices = @transform_9, window_bounds = array<i64: 1, 24>}, {pipeline_mode = #tpu.pipeline_mode<synchronous>, transform_indices = @transform_10, window_bounds = array<i64: 1, 24>}, {transform_indices = @transform_11, window_bounds = array<i64: 1, 8, 24>}]} {
    %c0 = arith.constant 0 : index
    %c0_0 = arith.constant 0 : index
    %0 = vector.load %arg8[%c0, %c0_0] : memref<24x24xf32, #tpu.memory_space<vmem>>, vector<24x24xf32>
    %cst = arith.constant 0.000000e+00 : f32
    %1 = vector.broadcast %cst : f32 to vector<8x24xf32>
    %c0_1 = arith.constant 0 : index
    %c0_2 = arith.constant 0 : index
    %c0_3 = arith.constant 0 : index
    %2 = tpu.strided_load %arg1[%c0_1, %c0_2, %c0_3] {strides = array<i32: 1, 2, 1>} : memref<1x18x16xf32, #tpu.memory_space<vmem>>, vector<1x8x16xf32>
    %3 = vector.shape_cast %2 : vector<1x8x16xf32> to vector<8x16xf32>
    %c0_4 = arith.constant 0 : index
    %c0_5 = arith.constant 0 : index
    %c0_6 = arith.constant 0 : index
    %4 = vector.load %arg2[%c0_4, %c0_5, %c0_6] : memref<3x16x24xf32, #tpu.memory_space<vmem>>, vector<1x16x24xf32>
    %5 = vector.shape_cast %4 : vector<1x16x24xf32> to vector<16x24xf32>
    %cst_7 = arith.constant dense<0.000000e+00> : vector<8x24xf32>
    %6 = tpu.matmul %3, %5, %cst_7 {dimension_numbers = #tpu.dot_dimension_numbers<[1], [0], [0], [1], [0, 0, 1, 1], [], []>} : vector<8x16xf32>, vector<16x24xf32>, vector<8x24xf32> -> vector<8x24xf32>
    %7 = arith.addf %1, %6 : vector<8x24xf32>
    %c0_8 = arith.constant 0 : index
    %c1 = arith.constant 1 : index
    %c0_9 = arith.constant 0 : index
    %8 = tpu.strided_load %arg1[%c0_8, %c1, %c0_9] {strides = array<i32: 1, 2, 1>} : memref<1x18x16xf32, #tpu.memory_space<vmem>>, vector<1x8x16xf32>
    %9 = vector.shape_cast %8 : vector<1x8x16xf32> to vector<8x16xf32>
    %c1_10 = arith.constant 1 : index
    %c0_11 = arith.constant 0 : index
    %c0_12 = arith.constant 0 : index
    %10 = vector.load %arg2[%c1_10, %c0_11, %c0_12] : memref<3x16x24xf32, #tpu.memory_space<vmem>>, vector<1x16x24xf32>
    %11 = vector.shape_cast %10 : vector<1x16x24xf32> to vector<16x24xf32>
    %cst_13 = arith.constant dense<0.000000e+00> : vector<8x24xf32>
    %12 = tpu.matmul %9, %11, %cst_13 {dimension_numbers = #tpu.dot_dimension_numbers<[1], [0], [0], [1], [0, 0, 1, 1], [], []>} : vector<8x16xf32>, vector<16x24xf32>, vector<8x24xf32> -> vector<8x24xf32>
    %13 = arith.addf %7, %12 : vector<8x24xf32>
    %c0_14 = arith.constant 0 : index
    %c2 = arith.constant 2 : index
    %c0_15 = arith.constant 0 : index
    %14 = tpu.strided_load %arg1[%c0_14, %c2, %c0_15] {strides = array<i32: 1, 2, 1>} : memref<1x18x16xf32, #tpu.memory_space<vmem>>, vector<1x8x16xf32>
    %15 = vector.shape_cast %14 : vector<1x8x16xf32> to vector<8x16xf32>
    %c2_16 = arith.constant 2 : index
    %c0_17 = arith.constant 0 : index
    %c0_18 = arith.constant 0 : index
    %16 = vector.load %arg2[%c2_16, %c0_17, %c0_18] : memref<3x16x24xf32, #tpu.memory_space<vmem>>, vector<1x16x24xf32>
    %17 = vector.shape_cast %16 : vector<1x16x24xf32> to vector<16x24xf32>
    %cst_19 = arith.constant dense<0.000000e+00> : vector<8x24xf32>
    %18 = tpu.matmul %15, %17, %cst_19 {dimension_numbers = #tpu.dot_dimension_numbers<[1], [0], [0], [1], [0, 0, 1, 1], [], []>} : vector<8x16xf32>, vector<16x24xf32>, vector<8x24xf32> -> vector<8x24xf32>
    %19 = arith.addf %13, %18 : vector<8x24xf32>
    %c0_20 = arith.constant 0 : index
    %c0_21 = arith.constant 0 : index
    %20 = vector.load %arg3[%c0_20, %c0_21] : memref<1x24xf32, #tpu.memory_space<vmem>>, vector<1x24xf32>
    %c0_22 = arith.constant 0 : index
    %c0_23 = arith.constant 0 : index
    %21 = vector.load %arg4[%c0_22, %c0_23] : memref<1x24xf32, #tpu.memory_space<vmem>>, vector<1x24xf32>
    %cst_24 = arith.constant dense<0.000000e+00> : vector<24xf32>
    %22 = vector.multi_reduction <add>, %19, %cst_24 [0] : vector<8x24xf32> to vector<24xf32>
    %23 = vector.shape_cast %22 : vector<24xf32> to vector<1x24xf32>
    %cst_25 = arith.constant dense<0.000000e+00> : vector<1x24xf32>
    %24 = tpu.matmul %23, %0, %cst_25 {dimension_numbers = #tpu.dot_dimension_numbers<[1], [0], [0], [1], [0, 0, 1, 1], [], []>} : vector<1x24xf32>, vector<24x24xf32>, vector<1x24xf32> -> vector<1x24xf32>
    %cst_26 = arith.constant 0.0416666679 : f32
    %25 = vector.broadcast %cst_26 : f32 to vector<1x24xf32>
    %26 = arith.mulf %24, %25 : vector<1x24xf32>
    %27 = vector.broadcast %26 : vector<1x24xf32> to vector<8x24xf32>
    %28 = arith.subf %19, %27 : vector<8x24xf32>
    %29 = arith.mulf %28, %28 : vector<8x24xf32>
    %cst_27 = arith.constant dense<0.000000e+00> : vector<24xf32>
    %30 = vector.multi_reduction <add>, %29, %cst_27 [0] : vector<8x24xf32> to vector<24xf32>
    %31 = vector.shape_cast %30 : vector<24xf32> to vector<1x24xf32>
    %cst_28 = arith.constant dense<0.000000e+00> : vector<1x24xf32>
    %32 = tpu.matmul %31, %0, %cst_28 {dimension_numbers = #tpu.dot_dimension_numbers<[1], [0], [0], [1], [0, 0, 1, 1], [], []>} : vector<1x24xf32>, vector<24x24xf32>, vector<1x24xf32> -> vector<1x24xf32>
    %cst_29 = arith.constant 0.0416666679 : f32
    %33 = vector.broadcast %cst_29 : f32 to vector<1x24xf32>
    %34 = arith.mulf %32, %33 : vector<1x24xf32>
    %cst_30 = arith.constant 9.99999974E-6 : f32
    %35 = vector.broadcast %cst_30 : f32 to vector<1x24xf32>
    %36 = arith.addf %34, %35 : vector<1x24xf32>
    %37 = math.rsqrt %36 : vector<1x24xf32>
    %38 = vector.broadcast %37 : vector<1x24xf32> to vector<8x24xf32>
    %39 = arith.mulf %28, %38 : vector<8x24xf32>
    %40 = vector.broadcast %20 : vector<1x24xf32> to vector<8x24xf32>
    %41 = arith.mulf %39, %40 : vector<8x24xf32>
    %42 = vector.broadcast %21 : vector<1x24xf32> to vector<8x24xf32>
    %43 = arith.addf %41, %42 : vector<8x24xf32>
    %cst_31 = arith.constant 0.000000e+00 : f32
    %44 = vector.broadcast %cst_31 : f32 to vector<8x24xf32>
    %45 = arith.maximumf %43, %44 : vector<8x24xf32>
    %cst_32 = arith.constant 0.000000e+00 : f32
    %46 = vector.broadcast %cst_32 : f32 to vector<10x24xf32>
    %c0_33 = arith.constant 0 : index
    %c0_34 = arith.constant 0 : index
    %47 = vector.load %arg13[%c0_33, %c0_34] : memref<10x24xf32, #tpu.memory_space<vmem>>, vector<10x24xf32>
    tpu.vector_store %arg13[%c0_33, %c0_34], %46 {strides = array<i32>} : memref<10x24xf32, #tpu.memory_space<vmem>>, vector<10x24xf32>,
    %c1_35 = arith.constant 1 : index
    %c0_36 = arith.constant 0 : index
    %48 = vector.load %arg13[%c1_35, %c0_36] : memref<10x24xf32, #tpu.memory_space<vmem>>, vector<8x24xf32>
    tpu.vector_store %arg13[%c1_35, %c0_36], %45 {strides = array<i32>} : memref<10x24xf32, #tpu.memory_space<vmem>>, vector<8x24xf32>,
    %cst_37 = arith.constant 0.000000e+00 : f32
    %49 = vector.broadcast %cst_37 : f32 to vector<8x24xf32>
    %c0_38 = arith.constant 0 : index
    %c0_39 = arith.constant 0 : index
    %50 = vector.load %arg13[%c0_38, %c0_39] : memref<10x24xf32, #tpu.memory_space<vmem>>, vector<8x24xf32>
    %c0_40 = arith.constant 0 : index
    %c0_41 = arith.constant 0 : index
    %c0_42 = arith.constant 0 : index
    %51 = vector.load %arg5[%c0_40, %c0_41, %c0_42] : memref<3x24x24xf32, #tpu.memory_space<vmem>>, vector<1x24x24xf32>
    %52 = vector.shape_cast %51 : vector<1x24x24xf32> to vector<24x24xf32>
    %cst_43 = arith.constant dense<0.000000e+00> : vector<8x24xf32>
    %53 = tpu.matmul %50, %52, %cst_43 {dimension_numbers = #tpu.dot_dimension_numbers<[1], [0], [0], [1], [0, 0, 1, 1], [], []>} : vector<8x24xf32>, vector<24x24xf32>, vector<8x24xf32> -> vector<8x24xf32>
    %54 = arith.addf %49, %53 : vector<8x24xf32>
    %c1_44 = arith.constant 1 : index
    %c0_45 = arith.constant 0 : index
    %55 = vector.load %arg13[%c1_44, %c0_45] : memref<10x24xf32, #tpu.memory_space<vmem>>, vector<8x24xf32>
    %c1_46 = arith.constant 1 : index
    %c0_47 = arith.constant 0 : index
    %c0_48 = arith.constant 0 : index
    %56 = vector.load %arg5[%c1_46, %c0_47, %c0_48] : memref<3x24x24xf32, #tpu.memory_space<vmem>>, vector<1x24x24xf32>
    %57 = vector.shape_cast %56 : vector<1x24x24xf32> to vector<24x24xf32>
    %cst_49 = arith.constant dense<0.000000e+00> : vector<8x24xf32>
    %58 = tpu.matmul %55, %57, %cst_49 {dimension_numbers = #tpu.dot_dimension_numbers<[1], [0], [0], [1], [0, 0, 1, 1], [], []>} : vector<8x24xf32>, vector<24x24xf32>, vector<8x24xf32> -> vector<8x24xf32>
    %59 = arith.addf %54, %58 : vector<8x24xf32>
    %c2_50 = arith.constant 2 : index
    %c0_51 = arith.constant 0 : index
    %60 = vector.load %arg13[%c2_50, %c0_51] : memref<10x24xf32, #tpu.memory_space<vmem>>, vector<8x24xf32>
    %c2_52 = arith.constant 2 : index
    %c0_53 = arith.constant 0 : index
    %c0_54 = arith.constant 0 : index
    %61 = vector.load %arg5[%c2_52, %c0_53, %c0_54] : memref<3x24x24xf32, #tpu.memory_space<vmem>>, vector<1x24x24xf32>
    %62 = vector.shape_cast %61 : vector<1x24x24xf32> to vector<24x24xf32>
    %cst_55 = arith.constant dense<0.000000e+00> : vector<8x24xf32>
    %63 = tpu.matmul %60, %62, %cst_55 {dimension_numbers = #tpu.dot_dimension_numbers<[1], [0], [0], [1], [0, 0, 1, 1], [], []>} : vector<8x24xf32>, vector<24x24xf32>, vector<8x24xf32> -> vector<8x24xf32>
    %64 = arith.addf %59, %63 : vector<8x24xf32>
    %c0_56 = arith.constant 0 : index
    %c0_57 = arith.constant 0 : index
    %65 = vector.load %arg6[%c0_56, %c0_57] : memref<1x24xf32, #tpu.memory_space<vmem>>, vector<1x24xf32>
    %c0_58 = arith.constant 0 : index
    %c0_59 = arith.constant 0 : index
    %66 = vector.load %arg7[%c0_58, %c0_59] : memref<1x24xf32, #tpu.memory_space<vmem>>, vector<1x24xf32>
    %cst_60 = arith.constant dense<0.000000e+00> : vector<24xf32>
    %67 = vector.multi_reduction <add>, %64, %cst_60 [0] : vector<8x24xf32> to vector<24xf32>
    %68 = vector.shape_cast %67 : vector<24xf32> to vector<1x24xf32>
    %cst_61 = arith.constant dense<0.000000e+00> : vector<1x24xf32>
    %69 = tpu.matmul %68, %0, %cst_61 {dimension_numbers = #tpu.dot_dimension_numbers<[1], [0], [0], [1], [0, 0, 1, 1], [], []>} : vector<1x24xf32>, vector<24x24xf32>, vector<1x24xf32> -> vector<1x24xf32>
    %cst_62 = arith.constant 0.0416666679 : f32
    %70 = vector.broadcast %cst_62 : f32 to vector<1x24xf32>
    %71 = arith.mulf %69, %70 : vector<1x24xf32>
    %72 = vector.broadcast %71 : vector<1x24xf32> to vector<8x24xf32>
    %73 = arith.subf %64, %72 : vector<8x24xf32>
    %74 = arith.mulf %73, %73 : vector<8x24xf32>
    %cst_63 = arith.constant dense<0.000000e+00> : vector<24xf32>
    %75 = vector.multi_reduction <add>, %74, %cst_63 [0] : vector<8x24xf32> to vector<24xf32>
    %76 = vector.shape_cast %75 : vector<24xf32> to vector<1x24xf32>
    %cst_64 = arith.constant dense<0.000000e+00> : vector<1x24xf32>
    %77 = tpu.matmul %76, %0, %cst_64 {dimension_numbers = #tpu.dot_dimension_numbers<[1], [0], [0], [1], [0, 0, 1, 1], [], []>} : vector<1x24xf32>, vector<24x24xf32>, vector<1x24xf32> -> vector<1x24xf32>
    %cst_65 = arith.constant 0.0416666679 : f32
    %78 = vector.broadcast %cst_65 : f32 to vector<1x24xf32>
    %79 = arith.mulf %77, %78 : vector<1x24xf32>
    %cst_66 = arith.constant 9.99999974E-6 : f32
    %80 = vector.broadcast %cst_66 : f32 to vector<1x24xf32>
    %81 = arith.addf %79, %80 : vector<1x24xf32>
    %82 = math.rsqrt %81 : vector<1x24xf32>
    %83 = vector.broadcast %82 : vector<1x24xf32> to vector<8x24xf32>
    %84 = arith.mulf %73, %83 : vector<8x24xf32>
    %85 = vector.broadcast %65 : vector<1x24xf32> to vector<8x24xf32>
    %86 = arith.mulf %84, %85 : vector<8x24xf32>
    %87 = vector.broadcast %66 : vector<1x24xf32> to vector<8x24xf32>
    %88 = arith.addf %86, %87 : vector<8x24xf32>
    %c0_67 = arith.constant 0 : index
    %c1_68 = arith.constant 1 : index
    %c0_69 = arith.constant 0 : index
    %89 = tpu.strided_load %arg1[%c0_67, %c1_68, %c0_69] {strides = array<i32: 1, 2, 1>} : memref<1x18x16xf32, #tpu.memory_space<vmem>>, vector<1x8x16xf32>
    %90 = vector.shape_cast %89 : vector<1x8x16xf32> to vector<8x16xf32>
    %c0_70 = arith.constant 0 : index
    %c0_71 = arith.constant 0 : index
    %91 = vector.load %arg9[%c0_70, %c0_71] : memref<16x24xf32, #tpu.memory_space<vmem>>, vector<16x24xf32>
    %cst_72 = arith.constant dense<0.000000e+00> : vector<8x24xf32>
    %92 = tpu.matmul %90, %91, %cst_72 {dimension_numbers = #tpu.dot_dimension_numbers<[1], [0], [0], [1], [0, 0, 1, 1], [], []>} : vector<8x16xf32>, vector<16x24xf32>, vector<8x24xf32> -> vector<8x24xf32>
    %c0_73 = arith.constant 0 : index
    %c0_74 = arith.constant 0 : index
    %93 = vector.load %arg10[%c0_73, %c0_74] : memref<1x24xf32, #tpu.memory_space<vmem>>, vector<1x24xf32>
    %c0_75 = arith.constant 0 : index
    %c0_76 = arith.constant 0 : index
    %94 = vector.load %arg11[%c0_75, %c0_76] : memref<1x24xf32, #tpu.memory_space<vmem>>, vector<1x24xf32>
    %cst_77 = arith.constant dense<0.000000e+00> : vector<24xf32>
    %95 = vector.multi_reduction <add>, %92, %cst_77 [0] : vector<8x24xf32> to vector<24xf32>
    %96 = vector.shape_cast %95 : vector<24xf32> to vector<1x24xf32>
    %cst_78 = arith.constant dense<0.000000e+00> : vector<1x24xf32>
    %97 = tpu.matmul %96, %0, %cst_78 {dimension_numbers = #tpu.dot_dimension_numbers<[1], [0], [0], [1], [0, 0, 1, 1], [], []>} : vector<1x24xf32>, vector<24x24xf32>, vector<1x24xf32> -> vector<1x24xf32>
    %cst_79 = arith.constant 0.0416666679 : f32
    %98 = vector.broadcast %cst_79 : f32 to vector<1x24xf32>
    %99 = arith.mulf %97, %98 : vector<1x24xf32>
    %100 = vector.broadcast %99 : vector<1x24xf32> to vector<8x24xf32>
    %101 = arith.subf %92, %100 : vector<8x24xf32>
    %102 = arith.mulf %101, %101 : vector<8x24xf32>
    %cst_80 = arith.constant dense<0.000000e+00> : vector<24xf32>
    %103 = vector.multi_reduction <add>, %102, %cst_80 [0] : vector<8x24xf32> to vector<24xf32>
    %104 = vector.shape_cast %103 : vector<24xf32> to vector<1x24xf32>
    %cst_81 = arith.constant dense<0.000000e+00> : vector<1x24xf32>
    %105 = tpu.matmul %104, %0, %cst_81 {dimension_numbers = #tpu.dot_dimension_numbers<[1], [0], [0], [1], [0, 0, 1, 1], [], []>} : vector<1x24xf32>, vector<24x24xf32>, vector<1x24xf32> -> vector<1x24xf32>
    %cst_82 = arith.constant 0.0416666679 : f32
    %106 = vector.broadcast %cst_82 : f32 to vector<1x24xf32>
    %107 = arith.mulf %105, %106 : vector<1x24xf32>
    %cst_83 = arith.constant 9.99999974E-6 : f32
    %108 = vector.broadcast %cst_83 : f32 to vector<1x24xf32>
    %109 = arith.addf %107, %108 : vector<1x24xf32>
    %110 = math.rsqrt %109 : vector<1x24xf32>
    %111 = vector.broadcast %110 : vector<1x24xf32> to vector<8x24xf32>
    %112 = arith.mulf %101, %111 : vector<8x24xf32>
    %113 = vector.broadcast %93 : vector<1x24xf32> to vector<8x24xf32>
    %114 = arith.mulf %112, %113 : vector<8x24xf32>
    %115 = vector.broadcast %94 : vector<1x24xf32> to vector<8x24xf32>
    %116 = arith.addf %114, %115 : vector<8x24xf32>
    %117 = arith.addf %88, %116 : vector<8x24xf32>
    %cst_84 = arith.constant 0.000000e+00 : f32
    %118 = vector.broadcast %cst_84 : f32 to vector<8x24xf32>
    %119 = arith.maximumf %117, %118 : vector<8x24xf32>
    %c0_85 = arith.constant 0 : index
    %c0_86 = arith.constant 0 : index
    %c0_87 = arith.constant 0 : index
    %120 = vector.load %arg12[%c0_85, %c0_86, %c0_87] : memref<1x8x24xf32, #tpu.memory_space<vmem>>, vector<1x8x24xf32>
    %121 = vector.shape_cast %120 : vector<1x8x24xf32> to vector<8x24xf32>
    %122 = vector.shape_cast %119 : vector<8x24xf32> to vector<1x8x24xf32>
    tpu.vector_store %arg12[%c0_85, %c0_86, %c0_87], %122 {strides = array<i32>} : memref<1x8x24xf32, #tpu.memory_space<vmem>>, vector<1x8x24xf32>,
    return
  }
  func.func @transform_0(%arg0: i32) -> (i32, i32, i32) {
    %c0_i32 = arith.constant 0 : i32
    %c0_i32_0 = arith.constant 0 : i32
    %c0_i32_1 = arith.constant 0 : i32
    return %arg0, %c0_i32, %c0_i32_0 : i32, i32, i32
  }
  func.func @transform_1(%arg0: i32) -> (i32, i32, i32) {
    %c0_i32 = arith.constant 0 : i32
    %c0_i32_0 = arith.constant 0 : i32
    %c0_i32_1 = arith.constant 0 : i32
    %c0_i32_2 = arith.constant 0 : i32
    return %c0_i32, %c0_i32_0, %c0_i32_1 : i32, i32, i32
  }
  func.func @transform_2(%arg0: i32) -> (i32, i32) {
    %c0_i32 = arith.constant 0 : i32
    %c0_i32_0 = arith.constant 0 : i32
    %c0_i32_1 = arith.constant 0 : i32
    return %c0_i32, %c0_i32_0 : i32, i32
  }
  func.func @transform_3(%arg0: i32) -> (i32, i32) {
    %c0_i32 = arith.constant 0 : i32
    %c0_i32_0 = arith.constant 0 : i32
    %c0_i32_1 = arith.constant 0 : i32
    return %c0_i32, %c0_i32_0 : i32, i32
  }
  func.func @transform_4(%arg0: i32) -> (i32, i32, i32) {
    %c0_i32 = arith.constant 0 : i32
    %c0_i32_0 = arith.constant 0 : i32
    %c0_i32_1 = arith.constant 0 : i32
    %c0_i32_2 = arith.constant 0 : i32
    return %c0_i32, %c0_i32_0, %c0_i32_1 : i32, i32, i32
  }
  func.func @transform_5(%arg0: i32) -> (i32, i32) {
    %c0_i32 = arith.constant 0 : i32
    %c0_i32_0 = arith.constant 0 : i32
    %c0_i32_1 = arith.constant 0 : i32
    return %c0_i32, %c0_i32_0 : i32, i32
  }
  func.func @transform_6(%arg0: i32) -> (i32, i32) {
    %c0_i32 = arith.constant 0 : i32
    %c0_i32_0 = arith.constant 0 : i32
    %c0_i32_1 = arith.constant 0 : i32
    return %c0_i32, %c0_i32_0 : i32, i32
  }
  func.func @transform_7(%arg0: i32) -> (i32, i32) {
    %c0_i32 = arith.constant 0 : i32
    %c0_i32_0 = arith.constant 0 : i32
    %c0_i32_1 = arith.constant 0 : i32
    return %c0_i32, %c0_i32_0 : i32, i32
  }
  func.func @transform_8(%arg0: i32) -> (i32, i32) {
    %c0_i32 = arith.constant 0 : i32
    %c0_i32_0 = arith.constant 0 : i32
    %c0_i32_1 = arith.constant 0 : i32
    return %c0_i32, %c0_i32_0 : i32, i32
  }
  func.func @transform_9(%arg0: i32) -> (i32, i32) {
    %c0_i32 = arith.constant 0 : i32
    %c0_i32_0 = arith.constant 0 : i32
    %c0_i32_1 = arith.constant 0 : i32
    return %c0_i32, %c0_i32_0 : i32, i32
  }
  func.func @transform_10(%arg0: i32) -> (i32, i32) {
    %c0_i32 = arith.constant 0 : i32
    %c0_i32_0 = arith.constant 0 : i32
    %c0_i32_1 = arith.constant 0 : i32
    return %c0_i32, %c0_i32_0 : i32, i32
  }
  func.func @transform_11(%arg0: i32) -> (i32, i32, i32) {
    %c0_i32 = arith.constant 0 : i32
    %c0_i32_0 = arith.constant 0 : i32
    %c0_i32_1 = arith.constant 0 : i32
    return %arg0, %c0_i32, %c0_i32_0 : i32, i32, i32
  }
}

</mosaic_0001>

<bundles_post_ra>
// kernel: tpu_custom_call.1
= control target key start
LH: loop header
LB: loop body
LE: loop exit
PB: predicated region body
PF: predicated region fallthrough
CT: control target
= control target key end

     0   :  { %s2553_s0 = inlined_call_operand.vmem [shape: f32[2,18,16], index: 0, kind: input, shape index: {}]   ;;  %s2554_s1 = inlined_call_operand.hbm [shape: f32[3,16,24], index: 1, kind: input, shape index: {}]   ;;  %s2555_s2 = inlined_call_operand.vmem [shape: f32[1,24], index: 2, kind: input, shape index: {}]   ;;  %s2556_s3 = inlined_call_operand.hbm [shape: f32[1,24], index: 3, kind: input, shape index: {}]   ;;  %s2557_s4 = inlined_call_operand.vmem [shape: f32[3,24,24], index: 4, kind: input, shape index: {}]   ;;  %s2558_s5 = inlined_call_operand.hbm [shape: f32[1,24], index: 5, kind: input, shape index: {}]   ;;  %s2559_s6 = inlined_call_operand.vmem [shape: f32[1,24], index: 6, kind: input, shape index: {}]   ;;  %s2560_s7 = inlined_call_operand.hbm [shape: f32[24,24], index: 7, kind: input, shape index: {}]   ;;  %s2561_s8 = inlined_call_operand.vmem [shape: f32[16,24], index: 8, kind: input, shape index: {}]   ;;  %s2562_s9 = inlined_call_operand.vmem [shape: f32[1,24], index: 9, kind: input, shape index: {}]   ;;  %s2563_s10 = inlined_call_operand.vmem [shape: f32[1,24], index: 10, kind: input, shape index: {}]   ;;  %s2564_s11 = inlined_call_operand.hbm [shape: f32[2,8,24], index: 11, kind: output, shape index: {}]  }
   0x1   :  { %2566 = sst [smem:[#allocation17_spill]] %s2556_s3 }
   0x2   :  { %16 = vsyncpa [#allocation4], 0 }
   0x3   :  { %17 = vsyncpa [#allocation7], 0 }
   0x4   :  { %18 = vsyncpa [#allocation10], 0 }
   0x5   :  { %19 = vsyncpa [#allocation5], 0 }
   0x6   :  { %21 = vsyncpa [#allocation5 + $0x1], 0  ;;  %s2224_s17 = smov 0   ;;  %s2226_s18 = smov 0  }
   0x7   :  { %s2228_s19 = smov 0   ;;  %s2230_s20 = smov 0  }
   0x8 LB: > { %s2245_s21 = sadd.s32 4294967295, %s2153_s20   ;;  %s1683_s22 = sadd.s32 4294967294, %s2153_s20   ;;  %s2153_s20 = sphi %s2230_s20, %s2583_s20   ;;  %s2149_s19 = sphi %s2228_s19, %s2582_s19   ;;  %s2145_s18 = sphi %s2226_s18, %s2581_s18   ;;  %s2141_s17 = sphi %s2224_s17, %s2580_s17  }
   0x9   : > { %s2249_s23 = sadd.s32 1, %s2153_s20   ;;  %s270_s24 = sadd.s32 1, %s2149_s19 }
   0xa   : > { %s267_s25 = ssub.s32 %s2153_s20, %s2249_s23  ;;  %p280_p0 = scmp.ne.s32.totalorder %s2149_s19, %s2145_s18 }
   0xb   : > { %p268_p1 = scmp.eq.s32.totalorder %s267_s25, 0  ;;  %p281_p2 = scmp.eq.s32.totalorder %s2245_s21, 1 }
   0xc   : > { %p286_p3 = scmp.ne.s32.totalorder %s2145_s18, %s2141_s17  ;;  %p287_p4 = scmp.eq.s32.totalorder %s1683_s22, 1 }
   0xd   : > { %s2260_s26 = scalar_select %p268_p1, %s2149_s19, %s270_s24  }
   0xe   : > { %p2262_p5 = por %p281_p2, %p280_p0  ;;  %p2266_p6 = por %p287_p4, %p286_p3 }
   0xf   : > { %2567 = sst [smem:[#allocation16_spill]] %s2260_s26  ;;  %p1684_p7 = scmp.ge.s32.totalorder %s2153_s20, 1 }
  0x10   : > { %p294_p8 = scmp.lt.s32.totalorder %s2153_s20, 3  ;;  %p2565_p9 = scmp.eq.s32.totalorder %s2245_s21, 0 }
  0x11   : > { %s2155_s30 = smov [#allocation6]   ;;  %s2156_s13 = smov [#allocation3]  }
  0x12   : > { %p2273_p10 = pnand %p1684_p7, %p294_p8  ;;  %s323_s12 = sshll.u32 %s2155_s30, 4  ;;  %s324_s12 = int_to_ptr.vmem [resolvable:$true] %s323_s12 }
  0x13   : > { %s306_s14 = sshll.u32 %s2156_s13, 4  ;;  %s2157_s16 = smov [#allocation8]   ;;  %s2285_s14 = int_to_ptr.vmem [resolvable:$true] %s306_s14 }
  0x14   : > { %p1905_p11 = pneg %p2273_p10  ;;  %s337_s22 = sshll.u32 %s2157_s16, 4  ;;  %s338_s22 = int_to_ptr.vmem [resolvable:$true] %s337_s22 }
  0x15   : > { %s1988_s24 = scalar_lea.vmem %s324_s12, 16  ;;  %s1995_s25 = scalar_lea.vmem %s324_s12, 32 }
  0x16   : > { %p2281_p12 = pnand %p2565_p9, %p1905_p11  ;;  %p1989_p0 = scmp.ne.s32.totalorder %s324_s12, %s1988_s24 }
  0x17   : > { %p1996_p3 = scmp.lt.s32.totalorder %s324_s12, %s324_s12  ;;  %p1997_p4 = scmp.lt.s32.totalorder %s1995_s25, %s1988_s24 }
  0x18   : > { %p1979_p13 = pneg %p2281_p12 }
  0x19   : > { %p1998_p7 = por %p1997_p4, %p1996_p3 }
  0x1a   : > { %p1991_p1 = pnand %p1989_p0, %p1979_p13 }
  0x1c   : > { %p1992_p2 = pneg %p1991_p1 }
  0x1e   : > { %p1999_p8 = pnand %p1998_p7, %p1992_p2 }
  0x20   : > { %2002 = shalt.err (!%p1999_p8)
}
  0x21   : > { %s2572_s3 = sld [smem:[#allocation17_spill]]  ;;  %s2014_s16 = scalar_lea.vmem %s2285_s14, 768 }
  0x22   : > { %p2015_p11 = scmp.ne.s32.totalorder %s2285_s14, %s2014_s16  ;;  %p2022_p3 = scmp.lt.s32.totalorder %s2285_s14, %s2285_s14 }
  0x23   : > { %p2023_p2 = scmp.lt.s32.totalorder %s2014_s16, %s2014_s16 }
  0x24   : > { %p2017_p0 = pnand %p2015_p11, %p1979_p13 }
  0x25   : > { %p2024_p4 = por %p2023_p2, %p2022_p3 }
  0x26   : > { %p2018_p1 = pneg %p2017_p0 }
  0x27   : > { %1911 = dma.hbm_to_vmem [thread:$0]  (!%p2281_p12), %s2572_s3, 16, %s324_s12, [#allocation7]  }
  0x28   : > { %p2025_p7 = pnand %p2024_p4, %p2018_p1 }
  0x2a   : > { %2028 = shalt.err (!%p2025_p7)
}
  0x2b   : > { %s2158_s24 = smov 128   ;;  %s2159_s25 = smov 8  }
  0x2c   : > { %1908 = dma.hbm_to_vmem [thread:$0]  (!%p2281_p12), %s2554_s1, 768, %s2285_s14, [#allocation4], %s2158_s24, %s2158_s24, %s2159_s25  }
  0x2d   : > { %s2040_s13 = scalar_lea.vmem %s338_s22, 16  ;;  %s2047_s16 = scalar_lea.vmem %s338_s22, 32 }
  0x2e   : > { %p2041_p8 = scmp.ne.s32.totalorder %s338_s22, %s2040_s13  ;;  %p2048_p1 = scmp.lt.s32.totalorder %s338_s22, %s338_s22 }
  0x2f   : > { %p2049_p3 = scmp.lt.s32.totalorder %s2047_s16, %s2040_s13 }
  0x30   : > { %p2043_p11 = pnand %p2041_p8, %p1979_p13 }
  0x31   : > { %p2050_p2 = por %p2049_p3, %p2048_p1 }
  0x32   : > { %p2044_p0 = pneg %p2043_p11 }
  0x34   : > { %p2051_p4 = pnand %p2050_p2, %p2044_p0 }
  0x36   : > { %2054 = shalt.err (!%p2051_p4)
}
  0x37   : > { %1914 = dma.hbm_to_vmem [thread:$0]  (!%p2281_p12), %s2558_s5, 16, %s338_s22, [#allocation7]  }
  0x38   : > { %s2160_s14 = smov [#allocation9]  }
  0x39   : > { %s350_s12 = sshll.u32 %s2160_s14, 4  ;;  %s351_s12 = int_to_ptr.vmem [resolvable:$true] %s350_s12 }
  0x3a   : > { %s2066_s30 = scalar_lea.vmem %s351_s12, 384  ;;  %p2074_p9 = scmp.lt.s32.totalorder %s351_s12, %s351_s12 }
  0x3b   : > { %p2067_p7 = scmp.ne.s32.totalorder %s351_s12, %s2066_s30  ;;  %p2075_p1 = scmp.lt.s32.totalorder %s2066_s30, %s2066_s30 }
  0x3d   : > { %p2069_p8 = pnand %p2067_p7, %p1979_p13  ;;  %p2076_p0 = por %p2075_p1, %p2074_p9 }
  0x3f   : > { %p2070_p11 = pneg %p2069_p8 }
  0x41   : > { %p2077_p3 = pnand %p2076_p0, %p2070_p11 }
  0x43   : > { %2080 = shalt.err (!%p2077_p3)
}
  0x44   : > { %1917 = dma.hbm_to_vmem [thread:$0]  (!%p2281_p12), %s2560_s7, 384, %s351_s12, [#allocation10], %s2158_s24, %s2158_s24, %s2159_s25  }
  0x45   : > { %383 = sbr.rel (%p2273_p10) target bundleno = 1629 (0x65d), region = 64  ;;  %p2573_p13 = scmp.eq.s32.totalorder (!%p2273_p10), %s2245_s21, 0 }
  0x4a   : > { %2124 = dma.done.wait (%p2573_p13), [#allocation4], 768   ;;  %p2574_p2 = pmov %p2573_p13 }
  0x4c   : > { %2126 = vsyncadd (%p2574_p2), [#allocation4], 4294966528  ;;  %p2575_p9 = pmov %p2574_p2 }
  0x4d   : > { %p2576_p4 = pmov %p2574_p2 }
  0x4e   : > { %2128 = dma.done.wait (%p2575_p9), [#allocation7], 32  }
  0x4f   : > { %2130 = vsyncadd (%p2576_p4), [#allocation7], 4294967264  ;;  %p2577_p7 = pmov %p2574_p2 }
  0x50   : > { %p2578_p12 = pmov %p2574_p2 }
  0x51   : > { %2132 = dma.done.wait (%p2577_p7), [#allocation10], 384  }
  0x52   : > { %2134 = vsyncadd (%p2578_p12), [#allocation10], 4294966912  ;;  %p435_p10 = scmp.lt.s32.totalorder %s2245_s21, 1  ;;  %v2161_v0 = vmov 0.0   ;;  %vm2162_vm0 = vmmov 0   ;;  %v450_v1 = vld [vmem:[#allocation3 + $0x18] sm:$0xff]  ;;  %v761_v28 = vlaneseq }
  0x53   : > { %1777 = vmatprep.subr.mxu0 %v2161_v0  ;;  %1784 = vmatprep.subr.mxu1 %v2161_v0  ;;  %v445_v2 = vld [vmem:[#allocation3 + $0x8] sm:$0xff]  ;;  %v449_v3 = vld [vmem:[#allocation3 + $0x10] sm:$0xff]  ;;  %vm451_vm1 = vcmask 130048   ;;  %v444_v5 = vld [vmem:[#allocation3] sm:$0xff]  ;;  %vm679_vm2 = vcmask 195584   ;;  %vm871_vm3 = vcmask 189440  }
  0x54   : > { %1781 = vmatprep.mubr.msk.f32.mxu0 %vm2162_vm0, %v2161_v0  ;;  %s436_s29 = scalar_select %p435_p10, %s2245_s21, 1  ;;  %1788 = vmatprep.mubr.msk.f32.mxu1 %vm2162_vm0, %v2161_v0  ;;  %v602_v7 = vld [vmem:[#allocation3 + $0x28] sm:$0xff]  ;;  %v601_v8 = vld [vmem:[#allocation3 + $0x20] sm:$0xff]  ;;  %870 = vst.msk [vmem:[#allocation2] sm:$0xff] %vm679_vm2, %v2161_v0  ;;  %v2388_v12 = vld [vmem:[#allocation9] sm:$0xff]  ;;  %v762_v29 = vshrl.u32 %v761_v28, 7 }
  0x55   : > { %1778 = vmatpush3.msra.mxu0 %v450_v1  ;;  %1785 = vmatpush3.msra.mxu1 %v445_v2  ;;  %v2379_v10 = vld [vmem:[#allocation9 + $0x10] sm:$0xff]  ;;  %v2384_v11 = vld [vmem:[#allocation9 + $0x8] sm:$0xff]  ;;  %872 = vst.msk [vmem:[#allocation2 + $0x8] sm:$0x3] %vm871_vm3, %v2161_v0  ;;  %v1707_v46 = vld [vmem:[%s2557_s4 + $0x20] sm:$0xff]  ;;  %s1726_s22 = sshll.u32 %s2245_s21, 7 }
  0x56   : > { %s1886_s15 = smul.u32 24, %s436_s29  ;;  %1779 = vmatprep.subr.mxu0 %v2161_v0  ;;  %1786 = vmatprep.subr.mxu1 %v2161_v0  ;;  %v2401_v30 = vsub.s32 0, %v762_v29  ;;  %v1708_v44 = vld [vmem:[%s2557_s4 + $0x28] sm:$0xff]  ;;  %v877_v45 = vld [vmem:[%s2557_s4 + $0x10] sm:$0xff]  ;;  %v1706_v48 = vld [vmem:[%s2557_s4 + $0x18] sm:$0xff]  ;;  %s1581_s30 = scalar_lea.hbm %s2564_s11, %s1726_s22 }
  0x57   : > { %1780 = vmatpush3.msra.mxu0 %v449_v3  ;;  %1787 = vmatpush3.msra.mxu1 %v444_v5  ;;  %v876_v47 = vld [vmem:[%s2557_s4 + $0x8] sm:$0xff]  ;;  %v875_v49 = vld [vmem:[%s2557_s4] sm:$0xff]  ;;  %v1712_v2 = vld [vmem:[%s2557_s4 + $0x38] sm:$0xff]  ;;  %s2163_s29 = smov [#allocation11]  }
  0x58   : > { %s2357_s25 = scalar_lea.vmem %s2553_s0, %s1886_s15  ;;  %1791 = vmatprep.subr.mxu0 %v2161_v0  ;;  %1798 = vmatprep.subr.mxu1 %v2161_v0  ;;  %v1704_v56 = vld [vmem:[%s2555_s2] ss:$0 sm:$0xff]  ;;  %v1711_v3 = vld [vmem:[%s2557_s4 + $0x30] sm:$0xff]  ;;  %s2085_s15 = sshll.u32 %s2163_s29, 4  ;;  %s2086_s15 = int_to_ptr.vmem [resolvable:$false] %s2085_s15 }
  0x59   : > { %v1697_v4 = vld [vmem:[%s2357_s25 + $0x1] ss:$2 sm:$0xff]  ;;  %v443_v6 = vld [vmem:[%s2357_s25] ss:$2 sm:$0xff]  ;;  %s2087_s21 = scalar_lea.vmem %s2086_s15, 256 }
  0x5a   : > { %1782 = vmatmul.mubr.msk.f32.vlgmr.msra.gmra.mxu0 %vm451_vm1, %v1697_v4  ;;  %1789 = vmatmul.mubr.msk.f32.vlgmr.msra.gmra.mxu1 %vm451_vm1, %v443_v6  ;;  %v1700_v9 = vld [vmem:[%s2357_s25 + $0x2] ss:$2 sm:$0xff]  ;;  %v1705_v58 = vld [vmem:[#allocation6] ss:$0 sm:$0xff] }
  0x5b   : > { %1792 = vmatpush3.msra.mxu0 %v602_v7  ;;  %1795 = vmatprep.mubr.msk.f32.mxu0 %vm2162_vm0, %v2161_v0  ;;  %v1713_v62 = vld [vmem:[%s2557_s4 + $0x40] sm:$0xff] }
  0x5c   : > { %1793 = vmatprep.subr.mxu0 %v2161_v0  ;;  %1804 = vmatprep.mubr.msk.f32.mxu1 %vm2162_vm0, %v2161_v0 }
  0x5d   : > { %1794 = vmatpush3.msra.mxu0 %v601_v8  ;;  %1799 = vmatpush3.msra.mxu1 %v2379_v10 }
  0x5e   : > { %1796 = vmatmul.mubr.msk.f32.vlgmr.msra.gmra.mxu0 %vm451_vm1, %v1700_v9  ;;  %1807 = vmatprep.subr.mxu0 %v2161_v0 }
  0x5f   : > { %1813 = vmatprep.mubr.msk.f32.mxu0 %vm2162_vm0, %v2161_v0  ;;  %1808 = vmatpush3.msra.mxu0 %v2379_v10 }
  0x60   : > { %1800 = vmatprep.subr.mxu1 %v2161_v0  ;;  %1809 = vmatprep.subr.mxu0 %v2161_v0 }
  0x61   : > { %1801 = vmatpush3.msra.mxu1 %v2384_v11  ;;  %1810 = vmatpush3.msra.mxu0 %v2384_v11 }
  0x62   : > { %1802 = vmatprep.subr.mxu1 %v2161_v0  ;;  %1811 = vmatprep.subr.mxu0 %v2161_v0 }
  0x63   : > { %1803 = vmatpush3.msra.mxu1 %v2388_v12  ;;  %1812 = vmatpush3.msra.mxu0 %v2388_v12 }
  0x64   : > { %1816 = vmatprep.subr.mxu1 %v2161_v0  ;;  %1825 = vmatprep.subr.mxu0 %v2161_v0 }
 0x11a   : > { %v521_v13 = vpop.f32.mrf.mxu0  ;;  %v594_v14 = vpop.f32.mrf.mxu1 }
 0x11b   : > { %v595_v16 = vadd.f32 %v594_v14, %v521_v13 }
 0x11c   : > { %v1783_v15 = vpop.f32.mrf.mxu0  ;;  %v1790_v17 = vpop.f32.mrf.mxu1 }
 0x11e   : > { %v672_v18 = vpop.f32.mrf.mxu0 }
 0x11f   : > { %v676_v19 = vadd.f32 %v672_v18, %v595_v16 }
 0x120   : > { %v1797_v20 = vpop.f32.mrf.mxu0 }
 0x121   : > { %v680_v21 = vsel %vm679_vm2, %v676_v19, 0.0 }
 0x122   : > { %v681_v22 = vrot.slane %v680_v21, 4 }
 0x124   : > { %v682_v23 = vadd.f32 %v681_v22, %v680_v21 }
 0x126   : > { %v683_v24 = vrot.slane %v682_v23, 2 }
 0x128   : > { %v684_v25 = vadd.f32 %v683_v24, %v682_v23  ;;  %v1301_v23 = vld [vmem:[%s2561_s8 + $0x8] sm:$0xff]  ;;  %v1300_v24 = vld [vmem:[%s2561_s8] sm:$0xff] }
 0x12a   : > { %v685_v26 = vrot.slane %v684_v25, 1 }
 0x12c   : > { %v686_v27 = vadd.f32 %v685_v26, %v684_v25  ;;  %v1719_v25 = vld [vmem:[%s2357_s25 + $0x1] ss:$2 sm:$0xff]  ;;  %s432_s25 = sand.u32 1, %s2145_s18  }
 0x12d   : > { %s1695_s14 = sshll.u32 %s432_s25, 3  ;;  %s1570_s3 = scalar_lea.sflag [#allocation5], %s432_s25 }
 0x12e   : > { %1805 = vmatmul.mubr.msk.f32.vlgmr.msra.gmra.mxu1 %vm679_vm2, %v686_v27  ;;  %s434_s24 = scalar_lea.vmem [#allocation11], %s1695_s14 }
 0x12f   : > { %1822 = vmatprep.mubr.msk.f32.mxu1 %vm2162_vm0, %v2161_v0  ;;  %1817 = vmatpush3.msra.mxu1 %v1708_v44  ;;  %s1583_s13 = sshll.u32 %s434_s24, 4  ;;  %s1584_s13 = int_to_ptr.vmem [resolvable:$true] %s1583_s13 }
 0x130   : > { %1818 = vmatprep.subr.mxu1 %v2161_v0  ;;  %s2081_s26 = scalar_lea.vmem %s1584_s13, 128  ;;  %p2088_p0 = scmp.lt.s32.totalorder %s1584_s13, %s2086_s15 }
 0x131   : > { %1819 = vmatpush3.msra.mxu1 %v1707_v46  ;;  %p2082_p8 = scmp.ne.s32.totalorder %s1584_s13, %s2081_s26  ;;  %p2089_p3 = scmp.lt.s32.totalorder %s2087_s21, %s2081_s26 }
 0x132   : > { %1820 = vmatprep.subr.mxu1 %v2161_v0 }
 0x133   : > { %1821 = vmatpush3.msra.mxu1 %v1706_v48  ;;  %p2083_p11 = pnand %p2082_p8, %p2262_p5  ;;  %p2090_p13 = por %p2089_p3, %p2088_p0 }
 0x134   : > { %1834 = vmatprep.subr.mxu1 %v2161_v0 }
 0x135   : > { %p2084_p1 = pneg %p2083_p11 }
 0x137   : > { %p2091_p2 = pnand %p2090_p13, %p2084_p1 }
 0x1ee   : > { %v756_v31 = vpop.f32.mrf.mxu1 }
 0x1ef   : > { %v760_v32 = vmul.f32 0.041666668, %v756_v31 }
 0x1f0   : > { %v1806_v33 = vpop.f32.mrf.mxu1 }
 0x1f1   : > { %v764_v34 = vrot.slane %v760_v32, %v2401_v30 }
 0x1f3   : > { %v765_v35 = vsub.f32 %v676_v19, %v764_v34 }
 0x1f5   : > { %v766_v36 = vmul.f32 %v765_v35, %v765_v35 }
 0x1f7   : > { %v767_v37 = vsel %vm679_vm2, %v766_v36, 0.0 }
 0x1f8   : > { %v768_v38 = vrot.slane %v767_v37, 4 }
 0x1fa   : > { %v769_v39 = vadd.f32 %v768_v38, %v767_v37 }
 0x1fc   : > { %v770_v40 = vrot.slane %v769_v39, 2 }
 0x1fe   : > { %v771_v41 = vadd.f32 %v770_v40, %v769_v39 }
 0x200   : > { %v772_v42 = vrot.slane %v771_v41, 1 }
 0x202   : > { %v773_v43 = vadd.f32 %v772_v42, %v771_v41 }
 0x204   : > { %1814 = vmatmul.mubr.msk.f32.vlgmr.msra.gmra.mxu0 %vm679_vm2, %v773_v43 }
 0x205   : > { %1831 = vmatprep.mubr.msk.f32.mxu0 %vm2162_vm0, %v2161_v0  ;;  %1826 = vmatpush3.msra.mxu0 %v877_v45 }
 0x206   : > { %1827 = vmatprep.subr.mxu0 %v2161_v0 }
 0x207   : > { %1828 = vmatpush3.msra.mxu0 %v876_v47 }
 0x208   : > { %1829 = vmatprep.subr.mxu0 %v2161_v0 }
 0x209   : > { %1830 = vmatpush3.msra.mxu0 %v875_v49 }
 0x20a   : > { %1843 = vmatprep.subr.mxu0 %v2161_v0 }
 0x2c4   : > { %v843_v50 = vpop.f32.mrf.mxu0 }
 0x2c5   : > { %v847_v51 = vmul.f32 0.041666668, %v843_v50 }
 0x2c6   : > { %v1815_v52 = vpop.f32.mrf.mxu0 }
 0x2c7   : > { %v848_v53 = vadd.f32 1e-05, %v847_v51 }
 0x2c9   : > { %1971 = vrsqrt.f32 %v848_v53 }
 0x2d6   : > { %v1972_v54 = vpop.eup %1971 }
 0x2d7   : > { %v853_v55 = vrot.slane %v1972_v54, %v2401_v30 }
 0x2d9   : > { %v854_v57 = vmul.f32 %v853_v55, %v765_v35 }
 0x2db   : > { %v861_v59 = vmul.f32 %v1704_v56, %v854_v57 }
 0x2dd   : > { %v868_v60 = vadd.f32 %v1705_v58, %v861_v59 }
 0x2df   : > { %v869_v61 = vmax.f32 %v868_v60, 0.0 }
 0x2e1   : > { %873 = vst.msk [vmem:[#allocation2 + $0x1] sm:$0xff] %vm679_vm2, %v869_v61 }
 0x2e8   : > { %v878_v63 = vld [vmem:[#allocation2 + $0x1] sm:$0xff] }
 0x2e9   : > { %v874_v1 = vld [vmem:[#allocation2] sm:$0xff]  ;;  %1823 = vmatmul.mubr.msk.f32.vlgmr.msra.gmra.mxu1 %vm679_vm2, %v878_v63 }
 0x2ea   : > { %1832 = vmatmul.mubr.msk.f32.vlgmr.msra.gmra.mxu0 %vm679_vm2, %v874_v1  ;;  %1835 = vmatpush3.msra.mxu1 %v1713_v62  ;;  %v1029_v4 = vld [vmem:[#allocation2 + $0x2] sm:$0xff] }
 0x2eb   : > { %1840 = vmatprep.mubr.msk.f32.mxu1 %vm2162_vm0, %v2161_v0  ;;  %1836 = vmatprep.subr.mxu1 %v2161_v0 }
 0x2ec   : > { %1844 = vmatpush3.msra.mxu0 %v2379_v10  ;;  %1837 = vmatpush3.msra.mxu1 %v1712_v2 }
 0x2ed   : > { %1845 = vmatprep.subr.mxu0 %v2161_v0  ;;  %1838 = vmatprep.subr.mxu1 %v2161_v0 }
 0x2ee   : > { %1846 = vmatpush3.msra.mxu0 %v2384_v11  ;;  %1839 = vmatpush3.msra.mxu1 %v1711_v3 }
 0x2ef   : > { %1847 = vmatprep.subr.mxu0 %v2161_v0  ;;  %1841 = vmatmul.mubr.msk.f32.vlgmr.msra.gmra.mxu1 %vm679_vm2, %v1029_v4 }
 0x2f0   : > { %1848 = vmatpush3.msra.mxu0 %v2388_v12  ;;  %1849 = vmatprep.mubr.msk.f32.mxu0 %vm2162_vm0, %v2161_v0 }
 0x2f1   : > { %1861 = vmatprep.subr.mxu0 %v2161_v0  ;;  %1852 = vmatprep.subr.mxu1 %v2161_v0 }
 0x2f2   : > { %1858 = vmatprep.mubr.msk.f32.mxu1 %vm2162_vm0, %v2161_v0  ;;  %1853 = vmatpush3.msra.mxu1 %v2379_v10 }
 0x2f3   : > { %1854 = vmatprep.subr.mxu1 %v2161_v0 }
 0x2f4   : > { %1855 = vmatpush3.msra.mxu1 %v2384_v11 }
 0x2f5   : > { %1856 = vmatprep.subr.mxu1 %v2161_v0 }
 0x2f6   : > { %1857 = vmatpush3.msra.mxu1 %v2388_v12 }
 0x2f7   : > { %1868 = vmatprep.subr.mxu1 %v2161_v0 }
 0x3a9   : > { %v952_v5 = vpop.f32.mrf.mxu1 }
 0x3aa   : > { %v1025_v6 = vpop.f32.mrf.mxu0 }
 0x3ab   : > { %v1824_v7 = vpop.f32.mrf.mxu1  ;;  %v1026_v9 = vadd.f32 %v1025_v6, %v952_v5 }
 0x3ac   : > { %v1833_v8 = vpop.f32.mrf.mxu0  ;;  %v1717_v7 = vld [vmem:[#allocation8] ss:$0 sm:$0xff] }
 0x3af   : > { %v1103_v13 = vpop.f32.mrf.mxu1 }
 0x3b0   : > { %v1107_v14 = vadd.f32 %v1103_v13, %v1026_v9  ;;  %v1723_v9 = vld [vmem:[%s2562_s9] ss:$0 sm:$0xff] }
 0x3b1   : > { %v1842_v15 = vpop.f32.mrf.mxu1 }
 0x3b2   : > { %v1110_v16 = vsel %vm679_vm2, %v1107_v14, 0.0  ;;  %v1718_v15 = vld [vmem:[%s2559_s6] ss:$0 sm:$0xff] }
 0x3b3   : > { %v1111_v17 = vrot.slane %v1110_v16, 4 }
 0x3b5   : > { %v1112_v18 = vadd.f32 %v1111_v17, %v1110_v16  ;;  %v1724_v16 = vld [vmem:[%s2563_s10] ss:$0 sm:$0xff] }
 0x3b7   : > { %v1113_v19 = vrot.slane %v1112_v18, 2 }
 0x3b9   : > { %v1114_v20 = vadd.f32 %v1113_v19, %v1112_v18 }
 0x3bb   : > { %v1115_v21 = vrot.slane %v1114_v20, 1 }
 0x3bd   : > { %v1116_v22 = vadd.f32 %v1115_v21, %v1114_v20 }
 0x3bf   : > { %1850 = vmatmul.mubr.msk.f32.vlgmr.msra.gmra.mxu0 %vm679_vm2, %v1116_v22 }
 0x3c0   : > { %1862 = vmatpush3.msra.mxu0 %v1301_v23  ;;  %1865 = vmatprep.mubr.msk.f32.mxu0 %vm2162_vm0, %v2161_v0 }
 0x3c1   : > { %1863 = vmatprep.subr.mxu0 %v2161_v0 }
 0x3c2   : > { %1864 = vmatpush3.msra.mxu0 %v1300_v24 }
 0x3c3   : > { %1866 = vmatmul.mubr.msk.f32.vlgmr.msra.gmra.mxu0 %vm451_vm1, %v1719_v25  ;;  %1877 = vmatprep.subr.mxu0 %v2161_v0 }
 0x3c4   : > { %1878 = vmatpush3.msra.mxu0 %v2379_v10  ;;  %1883 = vmatprep.mubr.msk.f32.mxu0 %vm2162_vm0, %v2161_v0 }
 0x3c5   : > { %1879 = vmatprep.subr.mxu0 %v2161_v0 }
 0x3c6   : > { %1880 = vmatpush3.msra.mxu0 %v2384_v11 }
 0x3c7   : > { %1881 = vmatprep.subr.mxu0 %v2161_v0 }
 0x3c8   : > { %1882 = vmatpush3.msra.mxu0 %v2388_v12 }
 0x47f   : > { %v1186_v26 = vpop.f32.mrf.mxu0 }
 0x480   : > { %v1190_v27 = vmul.f32 0.041666668, %v1186_v26 }
 0x481   : > { %v1851_v28 = vpop.f32.mrf.mxu0 }
 0x482   : > { %v1194_v29 = vrot.slane %v1190_v27, %v2401_v30 }
 0x483   : > { %v1371_v31 = vpop.f32.mrf.mxu0 }
 0x484   : > { %v1195_v32 = vsub.f32 %v1107_v14, %v1194_v29  ;;  %v1377_v33 = vsel %vm679_vm2, %v1371_v31, 0.0 }
 0x485   : > { %v1378_v34 = vrot.slane %v1377_v33, 4  ;;  %v1867_v35 = vpop.f32.mrf.mxu0 }
 0x486   : > { %v1196_v36 = vmul.f32 %v1195_v32, %v1195_v32 }
 0x487   : > { %v1379_v39 = vadd.f32 %v1378_v34, %v1377_v33 }
 0x488   : > { %v1197_v37 = vsel %vm679_vm2, %v1196_v36, 0.0 }
 0x489   : > { %v1198_v38 = vrot.slane %v1197_v37, 4  ;;  %v1380_v42 = vrot.slane %v1379_v39, 2 }
 0x48b   : > { %v1199_v40 = vadd.f32 %v1198_v38, %v1197_v37  ;;  %v1381_v45 = vadd.f32 %v1380_v42, %v1379_v39 }
 0x48d   : > { %v1200_v41 = vrot.slane %v1199_v40, 2  ;;  %v1382_v47 = vrot.slane %v1381_v45, 1 }
 0x48f   : > { %v1201_v43 = vadd.f32 %v1200_v41, %v1199_v40  ;;  %v1383_v48 = vadd.f32 %v1382_v47, %v1381_v45 }
 0x491   : > { %v1202_v44 = vrot.slane %v1201_v43, 1 }
 0x493   : > { %v1203_v46 = vadd.f32 %v1202_v44, %v1201_v43 }
 0x495   : > { %1859 = vmatmul.mubr.msk.f32.vlgmr.msra.gmra.mxu1 %vm679_vm2, %v1203_v46 }
 0x496   : > { %1869 = vmatpush3.msra.mxu1 %v2379_v10  ;;  %1874 = vmatprep.mubr.msk.f32.mxu1 %vm2162_vm0, %v2161_v0 }
 0x497   : > { %1870 = vmatprep.subr.mxu1 %v2161_v0 }
 0x498   : > { %1871 = vmatpush3.msra.mxu1 %v2384_v11 }
 0x499   : > { %1872 = vmatprep.subr.mxu1 %v2161_v0 }
 0x49a   : > { %1873 = vmatpush3.msra.mxu1 %v2388_v12 }
 0x49b   : > { %1875 = vmatmul.mubr.msk.f32.vlgmr.msra.gmra.mxu1 %vm679_vm2, %v1383_v48 }
 0x555   : > { %v1273_v49 = vpop.f32.mrf.mxu1 }
 0x556   : > { %v1277_v60 = vmul.f32 0.041666668, %v1273_v49 }
 0x557   : > { %v1860_v50 = vpop.f32.mrf.mxu1 }
 0x558   : > { %v1278_v61 = vadd.f32 1e-05, %v1277_v60 }
 0x55a   : > { %1973 = vrsqrt.f32 %v1278_v61 }
 0x55b   : > { %v1453_v51 = vpop.f32.mrf.mxu1 }
 0x55c   : > { %v1457_v52 = vmul.f32 0.041666668, %v1453_v51 }
 0x55d   : > { %v1876_v53 = vpop.f32.mrf.mxu1 }
 0x55e   : > { %v1461_v10 = vrot.slane %v1457_v52, %v2401_v30 }
 0x560   : > { %v1462_v54 = vsub.f32 %v1371_v31, %v1461_v10 }
 0x562   : > { %v1463_v55 = vmul.f32 %v1462_v54, %v1462_v54 }
 0x564   : > { %v1464_v56 = vsel %vm679_vm2, %v1463_v55, 0.0 }
 0x565   : > { %v1465_v57 = vrot.slane %v1464_v56, 4 }
 0x567   : > { %v1466_v11 = vadd.f32 %v1465_v57, %v1464_v56  ;;  %v1974_v3 = vpop.eup %1973 }
 0x568   : > { %v1283_v4 = vrot.slane %v1974_v3, %v2401_v30 }
 0x569   : > { %v1467_v58 = vrot.slane %v1466_v11, 2 }
 0x56a   : > { %v1284_v5 = vmul.f32 %v1283_v4, %v1195_v32 }
 0x56b   : > { %v1468_v0 = vadd.f32 %v1467_v58, %v1466_v11 }
 0x56c   : > { %v1291_v14 = vmul.f32 %v1717_v7, %v1284_v5 }
 0x56d   : > { %v1469_v59 = vrot.slane %v1468_v0, 1 }
 0x56e   : > { %v1298_v18 = vadd.f32 %v1718_v15, %v1291_v14 }
 0x56f   : > { %v1470_v12 = vadd.f32 %v1469_v59, %v1468_v0 }
 0x571   : > { %1884 = vmatmul.mubr.msk.f32.vlgmr.msra.gmra.mxu0 %vm679_vm2, %v1470_v12 }
 0x631   : > { %v1540_v62 = vpop.f32.mrf.mxu0 }
 0x632   : > { %v1544_v63 = vmul.f32 0.041666668, %v1540_v62 }
 0x633   : > { %v1885_v1 = vpop.f32.mrf.mxu0 }
 0x634   : > { %v1545_v2 = vadd.f32 1e-05, %v1544_v63 }
 0x636   : > { %1975 = vrsqrt.f32 %v1545_v2 }
 0x643   : > { %v1976_v6 = vpop.eup %1975 }
 0x644   : > { %v1550_v8 = vrot.slane %v1976_v6, %v2401_v30 }
 0x646   : > { %v1551_v13 = vmul.f32 %v1550_v8, %v1462_v54 }
 0x648   : > { %v1558_v17 = vmul.f32 %v1723_v9, %v1551_v13 }
 0x64a   : > { %v1565_v19 = vadd.f32 %v1724_v16, %v1558_v17 }
 0x64c   : > { %v1566_v30 = vadd.f32 %v1565_v19, %v1298_v18 }
 0x64e   : > { %v1567_v20 = vmax.f32 %v1566_v30, 0.0 }
 0x650   : > { %1568 = vst.msk [vmem:[%s434_s24] sm:$0xff] %vm679_vm2, %v1567_v20 }
 0x651   : > { %2094 = shalt.err (!%p2091_p2)
}
 0x652   : > { %s2095_s14 = scalar_lea.hbm %s1581_s30, 128  ;;  %s2099_s24 = scalar_lea.hbm %s2564_s11, 256 }
 0x653   : > { %p2096_p9 = scmp.ne.s32.totalorder %s1581_s30, %s2095_s14  ;;  %p2100_p12 = scmp.lt.s32.totalorder %s1581_s30, %s2564_s11 }
 0x654   : > { %p2101_p10 = scmp.lt.s32.totalorder %s2099_s24, %s2095_s14 }
 0x655   : > { %p2097_p4 = pnand %p2096_p9, %p2262_p5 }
 0x656   : > { %p2102_p8 = por %p2101_p10, %p2100_p12 }
 0x657   : > { %p2098_p7 = pneg %p2097_p4 }
 0x659   : > { %p2103_p11 = pnand %p2102_p8, %p2098_p7 }
 0x65b   : > { %2106 = shalt.err (!%p2103_p11)
}
 0x65c   : > { %1903 = dma.vmem_to_hbm [thread:$0]  (%p2262_p5), %s1584_s13, 128, %s1581_s30, %s1570_s3  }
 0x65d PF: > { %p1930_p1 = scmp.ge.s32.totalorder %s2153_s20, 2  ;;  %s1595_s26 = sand.u32 1, %s2141_s17  }
 0x65e   : > { %s1596_s29 = scalar_lea.sflag [#allocation5], %s1595_s26 }
 0x65f   : > { %p1919_p0 = pnand %p1930_p1, %p2266_p6 }
 0x661   : > { %p1920_p3 = pneg %p1919_p0 }
 0x663   : > { %2136 = dma.done.wait (%p1920_p3), %s1596_s29, 128  }
 0x664   : > { %2138 = vsyncadd (%p1920_p3), %s1596_s29, 4294967168  ;;  %s2579_s15 = sld [smem:[#allocation16_spill]]  ;;  %p24_p13 = scmp.ge.s32.totalorder %s2249_s23, 4  }
 0x665   : > { %s2580_s17 = smov %s2145_s18  ;;  %s2581_s18 = smov %s2149_s19 }
 0x666   : > { %s2583_s20 = smov %s2249_s23  ;;  %26 = sbr.rel (!%p24_p13) target bundleno = 8 (0x8), region = 122 }
 0x66a   : > { %s2582_s19 = smov %s2579_s15 }
 0x66b   :  { %1601 = vsyncpa [#allocation4], 1 }
 0x66c   :  { %1603 = vsyncpa [#allocation4 + $0x1], 1 }
 0x66d   :  { %1604 = vsyncpa [#allocation7], 1 }
 0x66e   :  { %1605 = vsyncpa [#allocation10], 1 }
 0x66f   :  { %1606 = vsyncpa [#allocation5], 1 }
 0x670   :  { %1608 = vsyncpa [#allocation5 + $0x1], 1 }

</bundles_post_ra>
